<compile_context>
chip_gen: v7x
topology: tpu7x:2x2x1
jax: 0.10.0
libtpu: 0.0.40
codegen_flags: <defaults>
</compile_context>

<pallas_src>
import math

import jax
import jax.numpy as jnp
from jax.experimental import pallas as pl
from jax.experimental.pallas import tpu as pltpu

_MIB = 1024 * 1024


def _build_pe(d_model: int, seq_len: int) -> jnp.ndarray:
    """Sinusoidal positional-encoding table, shape (seq_len, d_model), fp32."""
    pos = jnp.arange(seq_len, dtype=jnp.float32)[:, None]                 # (S, 1)
    div = jnp.exp(jnp.arange(0, d_model, 2, dtype=jnp.float32)
                  * (-math.log(10000.0) / d_model))                       # (D/2,)
    ang = pos * div                                                       # (S, D/2)
    pe = jnp.zeros((seq_len, d_model), dtype=jnp.float32)
    pe = pe.at[:, 0::2].set(jnp.sin(ang))
    pe = pe.at[:, 1::2].set(jnp.cos(ang))
    return pe


def _pe_add_kernel(x_ref, pe_ref, o_ref):
    # x_ref: (TB, TF) tile; pe_ref: (1, TF) fp32 row broadcast over batch rows.
    # Add in fp32, cast to the output dtype at the store.
    o_ref[...] = (x_ref[...].astype(jnp.float32) + pe_ref[...]).astype(o_ref.dtype)


def _vmem_capacity_bytes() -> int:
    """Per-core VMEM capacity; conservative fallback (v7x per-TC) if unknown."""
    try:
        info = pltpu.get_tpu_info()
        for attr in ("vmem_capacity_bytes", "vmem_bytes", "vmem_size_bytes"):
            v = getattr(info, attr, None)
            if v:
                return int(v)
    except Exception:
        pass
    return 64 * _MIB


def _round_down(v: int, m: int) -> int:
    return (v // m) * m


def positional_encoding_2d(
    x: jnp.ndarray,
    pe_full: jnp.ndarray,
    *,
    min_pallas_elems: int = 1 << 20,
    target_block_bytes: int | None = None,
) -> jnp.ndarray:
    """x: (B, S, D); pe_full: (seq_len, D), seq_len >= S.  Returns x + pe[:S]."""
    B, S, D = x.shape
    assert pe_full.shape[0] >= S and pe_full.shape[1] == D, "pe table too small"

    pe = pe_full[:S, :].astype(jnp.float32)   # keep fp32 (matches torch buffer)

    # Small-shape bail-out: let XLA fuse the add; pallas_call overhead dominates.
    if B * S * D < min_pallas_elems:
        return (x.astype(jnp.float32) + pe[None]).astype(x.dtype)

    # Lane-dense view: fold (S, D) into one trailing axis of length F = S*D.
    F = S * D
    x2 = x.reshape(B, F)
    pe2 = pe.reshape(1, F)

    itemsize = jnp.dtype(x.dtype).itemsize

    # Generation-aware budgets.
    vmem_cap = _vmem_capacity_bytes()
    if target_block_bytes is None:
        # ~8 MiB blocks; pipelined footprint ~ 2*x + 2*out (+tiny pe) ~ 4x block.
        target_block_bytes = min(8 * _MIB, max(2 * _MIB, vmem_cap // 8))
    vmem_limit = max(32 * _MIB, min(vmem_cap - 16 * _MIB, 96 * _MIB))

    # Batch tile first (full extent is always a legal block dim), then lane
    # tile from the remaining byte budget (multiple of 128, or full extent).
    TB = B if B <= 256 else 256
    tf_budget = max(128, _round_down(target_block_bytes // max(1, TB * itemsize), 128))
    TF = F if F <= tf_budget else tf_budget

    nb = pl.cdiv(B, TB)
    nf = pl.cdiv(F, TF)

    # Put the axis with more tiles first so megacore (v7x) splits real work;
    # with F outer, the pe row is re-fetched once per F tile, not per step.
    if nf >= nb:
        grid = (nf, nb)
        x_map = lambda f, b: (b, f)
        pe_map = lambda f, b: (0, f)
    else:
        grid = (nb, nf)
        x_map = lambda b, f: (b, f)
        pe_map = lambda b, f: (0, f)

    cost = pl.CostEstimate(
        flops=B * F,
        transcendentals=0,
        bytes_accessed=2 * B * F * itemsize + F * 4,
    )

    out2 = pl.pallas_call(
        _pe_add_kernel,
        out_shape=jax.ShapeDtypeStruct((B, F), x.dtype),
        grid_spec=pltpu.PrefetchScalarGridSpec(
            num_scalar_prefetch=0,
            grid=grid,
            in_specs=[
                pl.BlockSpec((TB, TF), x_map),
                pl.BlockSpec((1, TF), pe_map),
            ],
            out_specs=pl.BlockSpec((TB, TF), x_map),
        ),
        compiler_params=pltpu.CompilerParams(
            dimension_semantics=("parallel", "parallel"),
            vmem_limit_bytes=int(vmem_limit),
        ),
        cost_estimate=cost,
    )(x2, pe2)

    return out2.reshape(B, S, D)


if __name__ == "__main__":
    d_model = 32
    seq_len = 16   # module __init__ seq_len (table length)

    key = jax.random.PRNGKey(0)
    k1, k2, k3 = jax.random.split(key, 3)

    pe_full = _build_pe(d_model, seq_len)

    # --- Case 1: module-sized toy input (B=2, S=8, D=32), forced through the
    # Pallas path to exercise the kernel at small shapes.
    B, S = 2, 8
    x_small = jax.random.normal(k1, (B, S, d_model), dtype=jnp.float32)
    out_small = jax.block_until_ready(
        positional_encoding_2d(x_small, pe_full, min_pallas_elems=0))
    ref_small = x_small + pe_full[None, :S, :]
    assert out_small.shape == (B, S, d_model)
    assert jnp.allclose(out_small, ref_small, atol=1e-6), "mismatch (small, pallas)"

    # Default call on the same tiny input takes the plain-JAX bail-out path.
    out_bail = jax.block_until_ready(positional_encoding_2d(x_small, pe_full))
    assert jnp.allclose(out_bail, ref_small, atol=1e-6), "mismatch (small, bail-out)"

    # --- Case 2: multi-tile grid with a ragged last F block (forced small
    # block budget): B=4, S=96, D=160 -> F=15360, TF=4096, grid=(4, 1).
    B2, S2, D2 = 4, 96, 160
    x_big = jax.random.normal(k2, (B2, S2, D2), dtype=jnp.float32)
    pe_big = _build_pe(D2, S2)
    out_big = jax.block_until_ready(positional_encoding_2d(
        x_big, pe_big, min_pallas_elems=0, target_block_bytes=64 * 1024))
    ref_big = x_big + pe_big[None, :S2, :]
    assert jnp.allclose(out_big, ref_big, atol=1e-6), "mismatch (tiled, pallas)"

    # --- Case 3: bf16 input, fp32 accumulation inside the kernel.
    x_bf = jax.random.normal(k3, (B2, S2, D2), dtype=jnp.float32).astype(jnp.bfloat16)
    out_bf = jax.block_until_ready(
        positional_encoding_2d(x_bf, pe_big, min_pallas_elems=0))
    ref_bf = (x_bf.astype(jnp.float32) + pe_big[None, :S2, :]).astype(jnp.bfloat16)
    assert out_bf.dtype == jnp.bfloat16
    assert jnp.allclose(out_bf.astype(jnp.float32), ref_bf.astype(jnp.float32),
                        atol=1e-2, rtol=1e-2), "mismatch (bf16, pallas)"

    print("KERNEL_OK")
</pallas_src>

<mosaic_0001>
module attributes {stable_mosaic.version = 11 : i64} {
  func.func @_pe_add_kernel(%arg0: i32, %arg1: i32, %arg2: memref<2x256xf32, #tpu.memory_space<vmem>>, %arg3: memref<1x256xf32, #tpu.memory_space<vmem>>, %arg4: memref<2x256xf32, #tpu.memory_space<vmem>>) attributes {dimension_semantics = [#tpu.dimension_semantics<parallel>, #tpu.dimension_semantics<parallel>], iteration_bounds = array<i64: 1, 1>, scalar_prefetch = 0 : i64, scratch_operands = 0 : i64, tpu.core_type = #tpu.core_type<tc>, window_params = [{transform_indices = @transform_0, window_bounds = array<i64: 2, 256>}, {transform_indices = @transform_1, window_bounds = array<i64: 1, 256>}, {transform_indices = @transform_2, window_bounds = array<i64: 2, 256>}]} {
    %c0 = arith.constant 0 : index
    %c0_0 = arith.constant 0 : index
    %0 = vector.load %arg2[%c0, %c0_0] : memref<2x256xf32, #tpu.memory_space<vmem>>, vector<2x256xf32>
    %c0_1 = arith.constant 0 : index
    %c0_2 = arith.constant 0 : index
    %1 = vector.load %arg3[%c0_1, %c0_2] : memref<1x256xf32, #tpu.memory_space<vmem>>, vector<1x256xf32>
    %2 = vector.broadcast %1 : vector<1x256xf32> to vector<2x256xf32>
    %3 = arith.addf %0, %2 : vector<2x256xf32>
    %c0_3 = arith.constant 0 : index
    %c0_4 = arith.constant 0 : index
    %4 = vector.load %arg4[%c0_3, %c0_4] : memref<2x256xf32, #tpu.memory_space<vmem>>, vector<2x256xf32>
    tpu.vector_store %arg4[%c0_3, %c0_4], %3 {strides = array<i32>} : memref<2x256xf32, #tpu.memory_space<vmem>>, vector<2x256xf32>,
    return
  }
  func.func @transform_0(%arg0: i32, %arg1: i32) -> (i32, i32) {
    %c0_i32 = arith.constant 0 : i32
    return %arg1, %arg0 : i32, i32
  }
  func.func @transform_1(%arg0: i32, %arg1: i32) -> (i32, i32) {
    %c0_i32 = arith.constant 0 : i32
    %c0_i32_0 = arith.constant 0 : i32
    return %c0_i32, %arg0 : i32, i32
  }
  func.func @transform_2(%arg0: i32, %arg1: i32) -> (i32, i32) {
    %c0_i32 = arith.constant 0 : i32
    return %arg1, %arg0 : i32, i32
  }
}

</mosaic_0001>

<bundles_post_ra>
// kernel: tpu_custom_call.1
= control target key start
LH: loop header
LB: loop body
LE: loop exit
PB: predicated region body
PF: predicated region fallthrough
CT: control target
= control target key end

     0   :  { %7 = vsyncpa [#allocation3], 0  ;;  %s157_s0 = inlined_call_operand.hbm [shape: f32[2,256], index: 0, kind: input, shape index: {}]   ;;  %s158_s1 = inlined_call_operand.vmem [shape: f32[1,256], index: 1, kind: input, shape index: {}]   ;;  %s159_s2 = inlined_call_operand.hbm [shape: f32[2,256], index: 2, kind: output, shape index: {}]  }
   0x1   :  { %8 = vsyncpa [#allocation4], 0  ;;  %s112_s9 = smov [#allocation2]   ;;  %s64_s13 = scalar_lea.hbm %s157_s0, 64 }
   0x2   :  { %s15_s10 = sshll.u32 %s112_s9, 4  ;;  %p65_p0 = scmp.ne.s32.totalorder %s157_s0, %s64_s13  ;;  %s16_s10 = int_to_ptr.vmem [resolvable:$true] %s15_s10 }
   0x3   :  { %p68_p1 = scmp.lt.u32.totalorder %s64_s13, %s157_s0 }
   0x5   :  { %p70_p2 = pnand %p68_p1, %p65_p0 }
   0x7   :  { %73 = shalt.err (!%p70_p2)
}
   0x8   :  { %s74_s18 = scalar_lea.vmem %s16_s10, 64  ;;  %p79_p4 = scmp.lt.s32.totalorder %s16_s10, %s16_s10 }
   0x9   :  { %p75_p3 = scmp.ne.s32.totalorder %s16_s10, %s74_s18  ;;  %p80_p5 = scmp.lt.s32.totalorder %s74_s18, %s74_s18 }
   0xb   :  { %p81_p6 = por %p80_p5, %p79_p4 }
   0xd   :  { %p82_p7 = pnand %p81_p6, %p75_p3 }
   0xf   :  { %85 = shalt.err (!%p82_p7)
}
  0x10   :  { %18 = dma.hbm_to_vmem [thread:$0]  %s157_s0, 64, %s16_s10, [#allocation3]  }
  0x11   :  { %108 = dma.done.wait [#allocation3], 64  }
  0x12   :  { %109 = vsyncadd [#allocation3], 4294967232  ;;  %v27_v0 = vlaneseq  ;;  %v113_v1 = vmov 1983009808   ;;  %v25_v7 = vld [vmem:[%s158_s1] sm:$0x3] }
  0x13   :  { %v37_v2 = vunpack.c.l.s4 %v113_v1  ;;  %v24_v12 = vld [vmem:[#allocation2] sm:$0xf]  ;;  %s114_s23 = smov [#allocation5]  }
  0x14   :  { %v28_v3 = vshrl.u32 %v27_v0, 7  ;;  %s52_s0 = sshll.u32 %s114_s23, 4  ;;  %s53_s0 = int_to_ptr.vmem [resolvable:$true] %s52_s0 }
  0x15   :  { %v38_v6 = vunpack.c.0.s8 %v37_v2  ;;  %s86_s24 = scalar_lea.vmem %s53_s0, 64  ;;  %p91_p9 = scmp.lt.s32.totalorder %s53_s0, %s53_s0 }
  0x16   :  { %v29_v4 = vsub.s32 0, %v28_v3  ;;  %v33_v5 = vsub.s32 1, %v28_v3  ;;  %p87_p8 = scmp.ne.s32.totalorder %s53_s0, %s86_s24  ;;  %p92_p10 = scmp.lt.s32.totalorder %s86_s24, %s86_s24 }
  0x17   :  { %v41_v10 = vsub.s32 %v38_v6, %v28_v3 }
  0x18   :  { %v30_v8 = vrot.slane %v25_v7, %v29_v4  ;;  %v34_v9 = vrot.slane %v25_v7, %v33_v5  ;;  %p93_p11 = por %p92_p10, %p91_p9 }
  0x1a   :  { %v35_v11 = vcombine.low %v30_v8, %v34_v9  ;;  %p94_p12 = pnand %p93_p11, %p87_p8 }
  0x1c   :  { %v42_v13 = vrot.slane %v35_v11, %v41_v10 }
  0x1e   :  { %v44_v14 = vadd.f32 %v42_v13, %v24_v12 }
  0x20   :  { %45 = vst [vmem:[#allocation5] sm:$0xf] %v44_v14 }
  0x21   :  { %97 = shalt.err (!%p94_p12)
}
  0x22   :  { %s98_s26 = scalar_lea.hbm %s159_s2, 64 }
  0x23   :  { %p99_p13 = scmp.ne.s32.totalorder %s159_s2, %s98_s26  ;;  %p102_p0 = scmp.lt.u32.totalorder %s98_s26, %s159_s2 }
  0x25   :  { %p104_p1 = pnand %p102_p0, %p99_p13 }
  0x27   :  { %107 = shalt.err (!%p104_p1)
}
  0x28   :  { %55 = dma.vmem_to_hbm [thread:$0]  %s53_s0, 64, %s159_s2, [#allocation4]  }
  0x29   :  { %110 = dma.done.wait [#allocation4], 64  }
  0x2a   :  { %111 = vsyncadd [#allocation4], 4294967232 }
  0x2b   :  { %59 = vsyncpa [#allocation3], 1 }
  0x2c   :  { %60 = vsyncpa [#allocation4], 1 }

</bundles_post_ra>
